<compile_context>
chip_gen: v7x
topology: tpu7x:2x2x1
jax: 0.10.0
libtpu: 0.0.40
codegen_flags: <defaults>
</compile_context>

<pallas_src>
import functools
import math

import jax
import jax.numpy as jnp
from jax.experimental import pallas as pl
from jax.experimental.pallas import tpu as pltpu


def _cdiv(a: int, b: int) -> int:
    return (a + b - 1) // b


def _round_up(a: int, b: int) -> int:
    return _cdiv(a, b) * b


def _gcn_kernel(adj_ref, x_ref, w_ref, b_ref, o_ref, *,
                tk, n, num_k, x_resident, ragged_k):
    """grid = (M tiles, K tiles).  o_ref: (TM, F_out) f32, revisited across K."""
    k = pl.program_id(1)

    # Initialize the resident output block with the (broadcast) bias.
    @pl.when(k == 0)
    def _init():
        o_ref[...] = jnp.broadcast_to(b_ref[...], o_ref.shape)

    # Support tile for this K slab: (TK, F_in) @ (F_in, F_out) in f32 (tiny),
    # then cast to adj's dtype for the dominant MXU matmul (f32 accumulation).
    if x_resident:
        start = pl.multiple_of(k * tk, 128)
        x_blk = x_ref[pl.ds(start, tk), :]
    else:
        x_blk = x_ref[...]
    sup = jnp.dot(x_blk, w_ref[...], preferred_element_type=jnp.float32)
    sup = sup.astype(adj_ref.dtype)

    if not ragged_k:
        o_ref[...] += jnp.dot(adj_ref[...], sup,
                              preferred_element_type=jnp.float32)
    else:
        # Only the last K tile overruns the adjacency; zero its out-of-bounds
        # columns there (the steady-state tiles stay mask-free).
        is_last = k == (num_k - 1)

        @pl.when(jnp.logical_not(is_last))
        def _body():
            o_ref[...] += jnp.dot(adj_ref[...], sup,
                                  preferred_element_type=jnp.float32)

        @pl.when(is_last)
        def _tail():
            a = adj_ref[...]
            col = jax.lax.broadcasted_iota(jnp.int32, a.shape, 1) + k * tk
            a = jnp.where(col < n, a, jnp.zeros_like(a))
            o_ref[...] += jnp.dot(a, sup, preferred_element_type=jnp.float32)


def graph_convolution(
    x,
    adj,
    weight,
    bias=None,
    *,
    tile_m: int = 512,
    tile_k: int = 2048,
    compute_dtype=jnp.bfloat16,
    x_resident_bytes: int = 4 * 1024 * 1024,
):
    """Pallas forward pass of GraphConvolution: adj @ (x @ weight) + bias.

    x:      (N, F_in)
    adj:    (N, N) dense adjacency.  Ideally already stored in `compute_dtype`
            (cast it where it is produced); a fallback cast is done here.
    weight: (F_in, F_out)
    bias:   (F_out,) or None
    returns (N, F_out) float32
    """
    assert tile_m % 16 == 0 and tile_k % 128 == 0, "tiles must be (16,128)-aligned"
    n, f_in = x.shape
    assert adj.shape == (n, n)
    f_out = weight.shape[1]

    # Fallback cast of the O(N^2) operand (prefer casting upstream).
    if adj.dtype != compute_dtype:
        adj = adj.astype(compute_dtype)

    # Clamp tiles: keep >= 2 blocks on the parallel M axis (megacore), keep
    # K tiles 128-aligned.  16-row alignment is safe for both f32 and bf16.
    tm = min(tile_m, _round_up(_cdiv(n, 2), 16))
    tk = min(tile_k, _round_up(n, 128))
    num_m = _cdiv(n, tm)
    num_k = _cdiv(n, tk)
    cover_k = num_k * tk
    ragged_k = cover_k != n

    # x / weight / bias are tiny and stay f32.  Only x is (cheaply) zero-padded
    # along rows so the K coverage is exact; adj is never copied/padded.
    x_p = x.astype(jnp.float32)
    if cover_k != n:
        x_p = jnp.pad(x_p, ((0, cover_k - n), (0, 0)))
    w = weight.astype(jnp.float32)
    if bias is None:
        b2d = jnp.zeros((1, f_out), jnp.float32)
    else:
        b2d = bias.reshape(1, f_out).astype(jnp.float32)

    x_resident = cover_k * f_in * 4 <= x_resident_bytes
    if x_resident:
        x_spec = pl.BlockSpec((cover_k, f_in), lambda i, k: (0, 0))
    else:
        x_spec = pl.BlockSpec((tk, f_in), lambda i, k: (k, 0))

    kernel = functools.partial(
        _gcn_kernel, tk=tk, n=n, num_k=num_k,
        x_resident=x_resident, ragged_k=ragged_k,
    )

    grid_spec = pltpu.PrefetchScalarGridSpec(
        num_scalar_prefetch=0,
        grid=(num_m, num_k),
        in_specs=[
            pl.BlockSpec((tm, tk), lambda i, k: (i, k)),       # adj tile (streamed)
            x_spec,                                            # x: resident or K-tiled
            pl.BlockSpec((f_in, f_out), lambda i, k: (0, 0)),  # weight, resident
            pl.BlockSpec((1, f_out), lambda i, k: (0, 0)),     # bias, resident
        ],
        out_specs=pl.BlockSpec((tm, f_out), lambda i, k: (i, 0)),
    )

    adj_itemsize = jnp.dtype(compute_dtype).itemsize
    x_reads = 1 if x_resident else num_m
    cost = pl.CostEstimate(
        flops=2 * n * n * f_out + 2 * num_m * cover_k * f_in * f_out,
        transcendentals=0,
        bytes_accessed=(
            n * n * adj_itemsize
            + x_reads * cover_k * f_in * 4
            + f_in * f_out * 4
            + f_out * 4
            + n * f_out * 4
        ),
    )

    out = pl.pallas_call(
        kernel,
        out_shape=jax.ShapeDtypeStruct((n, f_out), jnp.float32),
        grid_spec=grid_spec,
        compiler_params=pltpu.CompilerParams(
            dimension_semantics=("parallel", "arbitrary"),
            vmem_limit_bytes=40 * 1024 * 1024,  # v5e default scope is only 16 MiB
        ),
        cost_estimate=cost,
    )(adj, x_p, w, b2d)
    return out


def init_gcn_params(key, in_features, out_features, bias=True):
    """Deterministic re-implementation of GraphConvolution.reset_parameters."""
    stdv = 1.0 / math.sqrt(out_features)
    kw, kb = jax.random.split(key)
    weight = jax.random.uniform(
        kw, (in_features, out_features), dtype=jnp.float32, minval=-stdv, maxval=stdv
    )
    b = None
    if bias:
        b = jax.random.uniform(
            kb, (out_features,), dtype=jnp.float32, minval=-stdv, maxval=stdv
        )
    return weight, b


def _make_adj(key, n):
    """Deterministic row-normalized adjacency with self-loops."""
    raw = jax.random.uniform(key, (n, n), dtype=jnp.float32)
    adj = jnp.where(raw > 0.8, 1.0, 0.0) + jnp.eye(n, dtype=jnp.float32)
    return adj / jnp.sum(adj, axis=1, keepdims=True)


if __name__ == "__main__":
    key = jax.random.PRNGKey(0)
    k_x, k_adj, k_param, k_x2, k_adj2 = jax.random.split(key, 5)

    N, F_IN, F_OUT = 256, 32, 128
    x = jax.random.normal(k_x, (N, F_IN), dtype=jnp.float32)
    adj = _make_adj(k_adj, N)
    weight, bias = init_gcn_params(k_param, F_IN, F_OUT, bias=True)
    ref = adj @ (x @ weight) + bias[None, :]

    # --- Case 1: default bf16-adjacency path (adj cast done "upstream"). ----
    adj_bf16 = adj.astype(jnp.bfloat16)
    out = graph_convolution(x, adj_bf16, weight, bias)
    out = jax.block_until_ready(out)
    assert out.shape == (N, F_OUT)
    assert jnp.allclose(out, ref, atol=5e-2, rtol=5e-2)

    # --- Case 2: f32 path, tight numerics check. ----------------------------
    out_f32 = graph_convolution(x, adj, weight, bias, compute_dtype=jnp.float32)
    out_f32 = jax.block_until_ready(out_f32)
    assert jnp.allclose(out_f32, ref, atol=1e-4, rtol=1e-4)

    # --- Case 3: ragged N (exercises un-padded adj + in-kernel tail mask),
    #             no bias, both dtypes. ------------------------------------
    N2 = 200
    x2 = jax.random.normal(k_x2, (N2, F_IN), dtype=jnp.float32)
    adj2 = _make_adj(k_adj2, N2)
    ref2 = adj2 @ (x2 @ weight)

    out2_f32 = graph_convolution(x2, adj2, weight, None, compute_dtype=jnp.float32)
    out2_f32 = jax.block_until_ready(out2_f32)
    assert out2_f32.shape == (N2, F_OUT)
    assert jnp.allclose(out2_f32, ref2, atol=1e-4, rtol=1e-4)

    out2_bf16 = graph_convolution(x2, adj2.astype(jnp.bfloat16), weight, None)
    out2_bf16 = jax.block_until_ready(out2_bf16)
    assert jnp.allclose(out2_bf16, ref2, atol=5e-2, rtol=5e-2)

    print("KERNEL_OK")
</pallas_src>

<mosaic_0001>
module attributes {stable_mosaic.version = 11 : i64} {
  func.func @_gcn_kernel(%arg0: i32, %arg1: i32, %arg2: memref<128x256xbf16, #tpu.memory_space<vmem>>, %arg3: memref<256x32xf32, #tpu.memory_space<vmem>>, %arg4: memref<32x128xf32, #tpu.memory_space<vmem>>, %arg5: memref<1x128xf32, #tpu.memory_space<vmem>>, %arg6: memref<128x128xf32, #tpu.memory_space<vmem>>) attributes {dimension_semantics = [#tpu.dimension_semantics<parallel>, #tpu.dimension_semantics<arbitrary>], iteration_bounds = array<i64: 2, 1>, scalar_prefetch = 0 : i64, scratch_operands = 0 : i64, tpu.core_type = #tpu.core_type<tc>, window_params = [{transform_indices = @transform_0, window_bounds = array<i64: 128, 256>}, {pipeline_mode = #tpu.pipeline_mode<synchronous>, transform_indices = @transform_1, window_bounds = array<i64: 256, 32>}, {pipeline_mode = #tpu.pipeline_mode<synchronous>, transform_indices = @transform_2, window_bounds = array<i64: 32, 128>}, {pipeline_mode = #tpu.pipeline_mode<synchronous>, transform_indices = @transform_3, window_bounds = array<i64: 1, 128>}, {transform_indices = @transform_4, window_bounds = array<i64: 128, 128>}]} {
    %c0_i32 = arith.constant 0 : i32
    %0 = arith.cmpi eq, %arg1, %c0_i32 : i32
    %1 = arith.extui %0 : i1 to i32
    %c0_i32_0 = arith.constant 0 : i32
    %2 = arith.cmpi ne, %1, %c0_i32_0 : i32
    scf.if %2 {
      %c0_10 = arith.constant 0 : index
      %c0_11 = arith.constant 0 : index
      %15 = vector.load %arg5[%c0_10, %c0_11] : memref<1x128xf32, #tpu.memory_space<vmem>>, vector<1x128xf32>
      %16 = vector.shape_cast %15 : vector<1x128xf32> to vector<1x128xf32>
      %17 = vector.broadcast %16 : vector<1x128xf32> to vector<128x128xf32>
      %c0_12 = arith.constant 0 : index
      %c0_13 = arith.constant 0 : index
      %18 = vector.load %arg6[%c0_12, %c0_13] : memref<128x128xf32, #tpu.memory_space<vmem>>, vector<128x128xf32>
      tpu.vector_store %arg6[%c0_12, %c0_13], %17 {strides = array<i32>} : memref<128x128xf32, #tpu.memory_space<vmem>>, vector<128x128xf32>,
    } else {
    }
    %c256_i32 = arith.constant 256 : i32
    %3 = arith.muli %arg1, %c256_i32 : i32
    %4 = tpu.assume_multiple %3, 128 : i32
    %5 = arith.index_cast %4 : i32 to index
    %c0 = arith.constant 0 : index
    %6 = vector.load %arg3[%5, %c0] : memref<256x32xf32, #tpu.memory_space<vmem>>, vector<256x32xf32>
    %c0_1 = arith.constant 0 : index
    %c0_2 = arith.constant 0 : index
    %7 = vector.load %arg4[%c0_1, %c0_2] : memref<32x128xf32, #tpu.memory_space<vmem>>, vector<32x128xf32>
    %cst = arith.constant dense<0.000000e+00> : vector<256x128xf32>
    %8 = tpu.matmul %6, %7, %cst {dimension_numbers = #tpu.dot_dimension_numbers<[1], [0], [0], [1], [0, 0, 1, 1], [], []>} : vector<256x32xf32>, vector<32x128xf32>, vector<256x128xf32> -> vector<256x128xf32>
    %9 = arith.truncf %8 : vector<256x128xf32> to vector<256x128xbf16>
    %c0_3 = arith.constant 0 : index
    %c0_4 = arith.constant 0 : index
    %10 = vector.load %arg6[%c0_3, %c0_4] : memref<128x128xf32, #tpu.memory_space<vmem>>, vector<128x128xf32>
    %c0_5 = arith.constant 0 : index
    %c0_6 = arith.constant 0 : index
    %11 = vector.load %arg2[%c0_5, %c0_6] : memref<128x256xbf16, #tpu.memory_space<vmem>>, vector<128x256xbf16>
    %cst_7 = arith.constant dense<0.000000e+00> : vector<128x128xf32>
    %12 = tpu.matmul %11, %9, %cst_7 {dimension_numbers = #tpu.dot_dimension_numbers<[1], [0], [0], [1], [0, 0, 1, 1], [], []>} : vector<128x256xbf16>, vector<256x128xbf16>, vector<128x128xf32> -> vector<128x128xf32>
    %13 = arith.addf %10, %12 : vector<128x128xf32>
    %c0_8 = arith.constant 0 : index
    %c0_9 = arith.constant 0 : index
    %14 = vector.load %arg6[%c0_8, %c0_9] : memref<128x128xf32, #tpu.memory_space<vmem>>, vector<128x128xf32>
    tpu.vector_store %arg6[%c0_8, %c0_9], %13 {strides = array<i32>} : memref<128x128xf32, #tpu.memory_space<vmem>>, vector<128x128xf32>,
    return
  }
  func.func @transform_0(%arg0: i32, %arg1: i32) -> (i32, i32) {
    %c0_i32 = arith.constant 0 : i32
    return %arg0, %arg1 : i32, i32
  }
  func.func @transform_1(%arg0: i32, %arg1: i32) -> (i32, i32) {
    %c0_i32 = arith.constant 0 : i32
    %c0_i32_0 = arith.constant 0 : i32
    %c0_i32_1 = arith.constant 0 : i32
    return %c0_i32, %c0_i32_0 : i32, i32
  }
  func.func @transform_2(%arg0: i32, %arg1: i32) -> (i32, i32) {
    %c0_i32 = arith.constant 0 : i32
    %c0_i32_0 = arith.constant 0 : i32
    %c0_i32_1 = arith.constant 0 : i32
    return %c0_i32, %c0_i32_0 : i32, i32
  }
  func.func @transform_3(%arg0: i32, %arg1: i32) -> (i32, i32) {
    %c0_i32 = arith.constant 0 : i32
    %c0_i32_0 = arith.constant 0 : i32
    %c0_i32_1 = arith.constant 0 : i32
    return %c0_i32, %c0_i32_0 : i32, i32
  }
  func.func @transform_4(%arg0: i32, %arg1: i32) -> (i32, i32) {
    %c0_i32 = arith.constant 0 : i32
    %c0_i32_0 = arith.constant 0 : i32
    return %arg0, %c0_i32 : i32, i32
  }
}

</mosaic_0001>

<bundles_post_ra>
// kernel: tpu_custom_call.1
= control target key start
LH: loop header
LB: loop body
LE: loop exit
PB: predicated region body
PF: predicated region fallthrough
CT: control target
= control target key end

     0   :  { %9 = vsyncpa [#allocation3], 0  ;;  %s1717_s0 = inlined_call_operand.vmem [shape: bf16[256,256], index: 0, kind: input, shape index: {}]   ;;  %s1718_s1 = inlined_call_operand.vmem [shape: f32[256,32], index: 1, kind: input, shape index: {}]   ;;  %s1719_s2 = inlined_call_operand.vmem [shape: f32[32,128], index: 2, kind: input, shape index: {}]   ;;  %s1720_s3 = inlined_call_operand.vmem [shape: f32[1,128], index: 3, kind: input, shape index: {}]   ;;  %s1721_s4 = inlined_call_operand.hbm [shape: f32[256,128], index: 4, kind: output, shape index: {}]  }
   0x1   :  { %11 = vsyncpa [#allocation3 + $0x1], 0  ;;  %s1401_s15 = smov 0   ;;  %s1403_s16 = smov 0  }
   0x2   :  { %s1405_s17 = smov 0   ;;  %s1407_s18 = smov 0  }
   0x3   :  { %s1409_s19 = smov 0   ;;  %s1411_s20 = smov 0  }
   0x4 LB: > { %s967_s21 = sadd.s32 4294967295, %s1371_s20   ;;  %s968_s22 = sadd.s32 4294967294, %s1371_s20   ;;  %s1371_s20 = sphi %s1411_s20, %s17_s20   ;;  %s1367_s19 = sphi %s1409_s19, %s1728_s19   ;;  %s1363_s18 = sphi %s1407_s18, %s1727_s18   ;;  %s1359_s17 = sphi %s1405_s17, %s1726_s17   ;;  %s1355_s16 = sphi %s1403_s16, %s1725_s16   ;;  %s1351_s15 = sphi %s1401_s15, %s1724_s15  }
   0x5   : > { %s29_s23 = sadd.s32 1, %s1367_s19  ;;  %s127_s24 = sadd.s32 1, %s1359_s17 }
   0x6   : > { %p31_p0 = scmp.ge.s32.totalorder %s29_s23, 2  ;;  %p137_p1 = scmp.ne.s32.totalorder %s1359_s17, %s1355_s16 }
   0x7   : > { %p138_p2 = scmp.eq.s32.totalorder %s967_s21, 1  ;;  %p143_p3 = scmp.ne.s32.totalorder %s1355_s16, %s1351_s15 }
   0x8   : > { %s1730_s23 = smov (%p31_p0, %s29_s23), 0  ;;  %p144_p5 = scmp.eq.s32.totalorder %s968_s22, 1 }
   0x9   : > { %p1441_p4 = por %p138_p2, %p137_p1  ;;  %s124_s26 = ssub.s32 %s1367_s19, %s1730_s23 }
   0xa   : > { %p971_p6 = scmp.ge.s32.totalorder %s1371_s20, 1  ;;  %p125_p7 = scmp.eq.s32.totalorder %s124_s26, 0 }
   0xb   : > { %p1448_p8 = por %p144_p5, %p143_p3  ;;  %p186_p9 = scmp.lt.s32.totalorder %s1371_s20, 3 }
   0xc   : > { %s1454_s28 = scalar_select %p125_p7, %s1359_s17, %s127_s24  }
   0xd   : > { %p187_p10 = pnand %p971_p6, %p186_p9 }
   0xe   : > { %v292_v0 = vld [vmem:[%s1719_s2] sm:$0xff] (!%p187_p10)  ;;  %v293_v1 = vld [vmem:[%s1719_s2 + $0x8] sm:$0xff] (!%p187_p10)  ;;  %v294_v2 = vld [vmem:[%s1719_s2 + $0x10] sm:$0xff] (!%p187_p10)  ;;  %vm296_vm0 = vcmask (!%p187_p10), 261120   ;;  %s973_s11 = sshll.u32 (!%p187_p10), %s1363_s18, 4  ;;  %s214_s22 = sand.u32 (!%p187_p10), 1, %s1355_s16  }
   0xf   : > { %190 = sbr.rel (%p187_p10) target bundleno = 586 (0x24a), region = 36  ;;  %v1188_v3 = vpack.c.bf16 (!%p187_p10), %v293_v1, %v292_v0  ;;  %v295_v4 = vld [vmem:[%s1719_s2 + $0x18] sm:$0xff] (!%p187_p10)  ;;  %v260_v5 = vld [vmem:[%s1718_s1] sm:$0xff] (!%p187_p10)  ;;  %v261_v7 = vld [vmem:[%s1718_s1 + $0x8] sm:$0xff] (!%p187_p10)  ;;  %p219_p11 = scmp.lt.s32.totalorder (!%p187_p10), %s973_s11, 31 }
  0x10   : > { %v1192_v6 = vpack.c.bf16 (!%p187_p10), %v295_v4, %v294_v2  ;;  %1140 = vmatprep.mubr.msk.f32.mxu0 (!%p187_p10), %vm296_vm0, %v260_v5  ;;  %v262_v8 = vld [vmem:[%s1718_s1 + $0x10] sm:$0xff] (!%p187_p10)  ;;  %v263_v9 = vld [vmem:[%s1718_s1 + $0x18] sm:$0xff] (!%p187_p10)  ;;  %v264_v10 = vld [vmem:[%s1718_s1 + $0x20] sm:$0xff] (!%p187_p10)  ;;  %s972_s24 = sshll.u32 (!%p187_p10), %s214_s22, 7  ;;  %s1031_s5 = sshll.u32 (!%p187_p10), %s1363_s18, 11 }
  0x11   : > { %1189 = vmatprep.subr.bf16.mxu0 (!%p187_p10), %v1188_v3  ;;  %v265_v11 = vld [vmem:[%s1718_s1 + $0x28] sm:$0xff] (!%p187_p10)  ;;  %v266_v12 = vld [vmem:[%s1718_s1 + $0x30] sm:$0xff] (!%p187_p10)  ;;  %v267_v13 = vld [vmem:[%s1718_s1 + $0x38] sm:$0xff] (!%p187_p10)  ;;  %s1628_s30 = scalar_lea.vmem (!%p187_p10), [#allocation2], %s972_s24  ;;  %s1662_s9 = scalar_lea.hbm (!%p187_p10), %s1721_s4, %s1031_s5 }
  0x12   : > { %1191 = vmatpush3.bf16.msra.mxu0 (!%p187_p10), %v1188_v3  ;;  %v268_v14 = vld [vmem:[%s1718_s1 + $0x40] sm:$0xff] (!%p187_p10)  ;;  %v269_v15 = vld [vmem:[%s1718_s1 + $0x48] sm:$0xff] (!%p187_p10)  ;;  %v270_v16 = vld [vmem:[%s1718_s1 + $0x50] sm:$0xff] (!%p187_p10)  ;;  %s889_s6 = sshll.u32 (!%p187_p10), %s1628_s30, 4  ;;  %s1671_s18 = scalar_lea.sflag (!%p187_p10), [#allocation3], %s214_s22  ;;  %s1664_s6 = int_to_ptr.vmem [resolvable:$true] %s889_s6 }
  0x13   : > { %1193 = vmatprep.subr.bf16.mxu0 (!%p187_p10), %v1192_v6  ;;  %v271_v17 = vld [vmem:[%s1718_s1 + $0x58] sm:$0xff] (!%p187_p10)  ;;  %v272_v18 = vld [vmem:[%s1718_s1 + $0x60] sm:$0xff] (!%p187_p10)  ;;  %v273_v19 = vld [vmem:[%s1718_s1 + $0x68] sm:$0xff] (!%p187_p10)  ;;  %s1293_s10 = scalar_lea.vmem (!%p187_p10), %s1664_s6, 2048 }
  0x14   : > { %v274_v20 = vld [vmem:[%s1718_s1 + $0x70] sm:$0xff] (!%p187_p10)  ;;  %v275_v21 = vld [vmem:[%s1718_s1 + $0x78] sm:$0xff] (!%p187_p10)  ;;  %v276_v22 = vld [vmem:[%s1718_s1 + $0x80] sm:$0xff] (!%p187_p10)  ;;  %p1294_p12 = scmp.ne.s32.totalorder (!%p187_p10), %s1664_s6, %s1293_s10 }
  0x15   : > { %v277_v23 = vld [vmem:[%s1718_s1 + $0x88] sm:$0xff] (!%p187_p10)  ;;  %v278_v24 = vld [vmem:[%s1718_s1 + $0x90] sm:$0xff] (!%p187_p10)  ;;  %v279_v25 = vld [vmem:[%s1718_s1 + $0x98] sm:$0xff] (!%p187_p10) }
  0x16   : > { %1195 = vmatpush3.bf16.msra.mxu0 %v1192_v6  ;;  %v280_v26 = vld [vmem:[%s1718_s1 + $0xa0] sm:$0xff]  ;;  %v281_v27 = vld [vmem:[%s1718_s1 + $0xa8] sm:$0xff]  ;;  %v282_v28 = vld [vmem:[%s1718_s1 + $0xb0] sm:$0xff]  ;;  %s1732_s11 = smov (!%p219_p11, %s973_s11), 31  ;;  %p1295_p13 = pnand %p1294_p12, %p1441_p4 }
  0x17   : > { %v283_v29 = vld [vmem:[%s1718_s1 + $0xb8] sm:$0xff]  ;;  %v284_v30 = vld [vmem:[%s1718_s1 + $0xc0] sm:$0xff]  ;;  %v285_v31 = vld [vmem:[%s1718_s1 + $0xc8] sm:$0xff]  ;;  %s1030_s12 = sshll.u32 %s1732_s11, 3  ;;  %s1373_s11 = smov [#allocation2]  }
  0x18   : > { %v286_v32 = vld [vmem:[%s1718_s1 + $0xd0] sm:$0xff]  ;;  %v287_v33 = vld [vmem:[%s1718_s1 + $0xd8] sm:$0xff]  ;;  %v288_v34 = vld [vmem:[%s1718_s1 + $0xe0] sm:$0xff]  ;;  %s1600_s21 = scalar_lea.vmem %s1717_s0, %s1030_s12  ;;  %p1296_p0 = pneg %p1295_p13 }
  0x19   : > { %1141 = vmatmul.mubr.msk.f32.vlgmr.msra.gmra.mrb[0].mxu0 %vm296_vm0, %v261_v7  ;;  %v289_v35 = vld [vmem:[%s1718_s1 + $0xe8] sm:$0xff]  ;;  %v290_v36 = vld [vmem:[%s1718_s1 + $0xf0] sm:$0xff]  ;;  %v291_v37 = vld [vmem:[%s1718_s1 + $0xf8] sm:$0xff]  ;;  %s1297_s12 = sshll.u32 %s1373_s11, 4  ;;  %s1298_s12 = int_to_ptr.vmem [resolvable:$false] %s1297_s12 }
  0x1a   : > { %1143 = vmatprep.mubr.msk.f32.mxu0 %vm296_vm0, %v262_v8  ;;  %v1271_v38 = vld [vmem:[%s1600_s21 + $0x14] ss:$8 sps:$4 sm:$0xff]   ;;  %v1289_v39 = vld [vmem:[%s1600_s21 + $0x4] ss:$8 sps:$4 sm:$0xff]   ;;  %s1299_s13 = scalar_lea.vmem %s1298_s12, 4096  ;;  %p1300_p1 = scmp.lt.s32.totalorder %s1664_s6, %s1298_s12 }
  0x1b   : > { %786 = vmatprep.mubr.bf16.mxu1 %v1271_v38  ;;  %p1301_p2 = scmp.lt.s32.totalorder %s1299_s13, %s1293_s10 }
  0x1d   : > { %1144 = vmatmul.mubr.msk.f32.gmra.mrb[2].mxu0 %vm296_vm0, %v263_v9  ;;  %p1302_p3 = por %p1301_p2, %p1300_p1 }
  0x1e   : > { %1146 = vmatprep.mubr.msk.f32.mxu0 %vm296_vm0, %v264_v10 }
  0x1f   : > { %p1303_p5 = pnand %p1302_p3, %p1296_p0 }
  0x21   : > { %1147 = vmatmul.mubr.msk.f32.gmra.mrb[4].mxu0 %vm296_vm0, %v265_v11 }
  0x22   : > { %1149 = vmatprep.mubr.msk.f32.mxu0 %vm296_vm0, %v266_v12 }
  0x25   : > { %1150 = vmatmul.mubr.msk.f32.gmra.mrb[6].mxu0 %vm296_vm0, %v267_v13 }
  0x26   : > { %1152 = vmatprep.mubr.msk.f32.mxu0 %vm296_vm0, %v268_v14 }
  0x29   : > { %1153 = vmatmul.mubr.msk.f32.gmra.mrb[8].mxu0 %vm296_vm0, %v269_v15 }
  0x2a   : > { %1155 = vmatprep.mubr.msk.f32.mxu0 %vm296_vm0, %v270_v16 }
  0x2d   : > { %1156 = vmatmul.mubr.msk.f32.gmra.mrb[10].mxu0 %vm296_vm0, %v271_v17 }
  0x2e   : > { %1158 = vmatprep.mubr.msk.f32.mxu0 %vm296_vm0, %v272_v18 }
  0x31   : > { %1159 = vmatmul.mubr.msk.f32.gmra.mrb[12].mxu0 %vm296_vm0, %v273_v19 }
  0x32   : > { %1161 = vmatprep.mubr.msk.f32.mxu0 %vm296_vm0, %v274_v20 }
  0x35   : > { %1162 = vmatmul.mubr.msk.f32.gmra.mrb[14].mxu0 %vm296_vm0, %v275_v21 }
  0x36   : > { %1164 = vmatprep.mubr.msk.f32.mxu0 %vm296_vm0, %v276_v22 }
  0x39   : > { %1165 = vmatmul.mubr.msk.f32.gmra.mrb[16].mxu0 %vm296_vm0, %v277_v23 }
  0x3a   : > { %1167 = vmatprep.mubr.msk.f32.mxu0 %vm296_vm0, %v278_v24  ;;  %v1269_v24 = vld [vmem:[%s1600_s21 + $0x10] ss:$8 sps:$4 sm:$0xff]  }
  0x3d   : > { %1168 = vmatmul.mubr.msk.f32.gmra.mrb[18].mxu0 %vm296_vm0, %v279_v25  ;;  %v1287_v25 = vld [vmem:[%s1600_s21] ss:$8 sps:$4 sm:$0xff]  }
  0x3e   : > { %1170 = vmatprep.mubr.msk.f32.mxu0 %vm296_vm0, %v280_v26  ;;  %v1272_v26 = vld [vmem:[%s1600_s21 + $0x24] ss:$8 sps:$4 sm:$0xff]  }
  0x41   : > { %1171 = vmatmul.mubr.msk.f32.gmra.mrb[20].mxu0 %vm296_vm0, %v281_v27  ;;  %v1274_v27 = vld [vmem:[%s1600_s21 + $0x20] ss:$8 sps:$4 sm:$0xff]  }
  0x42   : > { %1173 = vmatprep.mubr.msk.f32.mxu0 %vm296_vm0, %v282_v28  ;;  %v1275_v28 = vld [vmem:[%s1600_s21 + $0x34] ss:$8 sps:$4 sm:$0xff]  }
  0x45   : > { %1174 = vmatmul.mubr.msk.f32.gmra.mrb[22].mxu0 %vm296_vm0, %v283_v29  ;;  %v1277_v29 = vld [vmem:[%s1600_s21 + $0x30] ss:$8 sps:$4 sm:$0xff]  }
  0x46   : > { %1176 = vmatprep.mubr.msk.f32.mxu0 %vm296_vm0, %v284_v30  ;;  %v1278_v30 = vld [vmem:[%s1600_s21 + $0x44] ss:$8 sps:$4 sm:$0xff]  }
  0x49   : > { %1177 = vmatmul.mubr.msk.f32.gmra.mrb[24].mxu0 %vm296_vm0, %v285_v31  ;;  %v1280_v31 = vld [vmem:[%s1600_s21 + $0x40] ss:$8 sps:$4 sm:$0xff]  }
  0x4a   : > { %1179 = vmatprep.mubr.msk.f32.mxu0 %vm296_vm0, %v286_v32  ;;  %v1281_v32 = vld [vmem:[%s1600_s21 + $0x54] ss:$8 sps:$4 sm:$0xff]  }
  0x4d   : > { %1180 = vmatmul.mubr.msk.f32.gmra.mrb[26].mxu0 %vm296_vm0, %v287_v33  ;;  %v1283_v33 = vld [vmem:[%s1600_s21 + $0x50] ss:$8 sps:$4 sm:$0xff]  }
  0x4e   : > { %1182 = vmatprep.mubr.msk.f32.mxu0 %vm296_vm0, %v288_v34  ;;  %v1284_v34 = vld [vmem:[%s1600_s21 + $0x64] ss:$8 sps:$4 sm:$0xff]  }
  0x51   : > { %1183 = vmatmul.mubr.msk.f32.gmra.mrb[28].mxu0 %vm296_vm0, %v289_v35  ;;  %v1286_v35 = vld [vmem:[%s1600_s21 + $0x60] ss:$8 sps:$4 sm:$0xff]  }
  0x52   : > { %1185 = vmatprep.mubr.msk.f32.mxu0 %vm296_vm0, %v290_v36  ;;  %v1290_v36 = vld [vmem:[%s1600_s21 + $0x74] ss:$8 sps:$4 sm:$0xff]  }
  0x55   : > { %1186 = vmatmul.mubr.msk.f32.gmra.mrb[30].mxu0 %vm296_vm0, %v291_v37  ;;  %v1292_v37 = vld [vmem:[%s1600_s21 + $0x70] ss:$8 sps:$4 sm:$0xff]  }
  0x56   : > { %778 = vmatprep.mubr.bf16.mxu0 %v1289_v39 }
  0xec   : > { %v1142_v40 = vpop.f32.mrb[0].mxu0 }
  0xed   : > { %v459_v41 = vpop.f32.mrb[1].mxu0 }
  0xee   : > { %v618_v42 = vpack.c.bf16 %v1142_v40, %v459_v41  ;;  %v1624_v40 = vld [vmem:[%s1720_s3] ss:$0 sm:$0xff] }
  0xf0   : > { %v1145_v43 = vpop.f32.mrb[2].mxu0 }
  0xf1   : > { %v469_v44 = vpop.f32.mrb[3].mxu0 }
  0xf2   : > { %v619_v45 = vpack.c.bf16 %v1145_v43, %v469_v44 }
  0xf4   : > { %v1148_v46 = vpop.f32.mrb[4].mxu0 }
  0xf5   : > { %v479_v47 = vpop.f32.mrb[5].mxu0 }
  0xf6   : > { %v620_v48 = vpack.c.bf16 %v1148_v46, %v479_v47 }
  0xf8   : > { %v1151_v49 = vpop.f32.mrb[6].mxu0 }
  0xf9   : > { %v489_v50 = vpop.f32.mrb[7].mxu0 }
  0xfa   : > { %v621_v51 = vpack.c.bf16 %v1151_v49, %v489_v50 }
  0xfc   : > { %v1154_v52 = vpop.f32.mrb[8].mxu0 }
  0xfd   : > { %v499_v53 = vpop.f32.mrb[9].mxu0 }
  0xfe   : > { %v622_v54 = vpack.c.bf16 %v1154_v52, %v499_v53 }
 0x100   : > { %v1157_v55 = vpop.f32.mrb[10].mxu0 }
 0x101   : > { %v509_v56 = vpop.f32.mrb[11].mxu0 }
 0x102   : > { %v623_v57 = vpack.c.bf16 %v1157_v55, %v509_v56 }
 0x104   : > { %v1160_v58 = vpop.f32.mrb[12].mxu0 }
 0x105   : > { %v519_v59 = vpop.f32.mrb[13].mxu0 }
 0x106   : > { %v624_v60 = vpack.c.bf16 %v1160_v58, %v519_v59 }
 0x108   : > { %v1163_v61 = vpop.f32.mrb[14].mxu0 }
 0x109   : > { %v529_v62 = vpop.f32.mrb[15].mxu0 }
 0x10a   : > { %v625_v63 = vpack.c.bf16 %v1163_v61, %v529_v62 }
 0x10c   : > { %v1166_v0 = vpop.f32.mrb[16].mxu0 }
 0x10d   : > { %v539_v1 = vpop.f32.mrb[17].mxu0 }
 0x10e   : > { %v626_v2 = vpack.c.bf16 %v1166_v0, %v539_v1 }
 0x110   : > { %v1169_v3 = vpop.f32.mrb[18].mxu0  ;;  %1068 = vmatprep.subr.bf16.mxu0 %v626_v2  ;;  %1196 = vmatprep.subr.bf16.mxu1 %v626_v2 }
 0x111   : > { %v549_v4 = vpop.f32.mrb[19].mxu0  ;;  %1069 = vmatpush3.bf16.msra.mxu0 %v618_v42  ;;  %1204 = vmatpush3.bf16.msra.mxu1 %v618_v42 }
 0x112   : > { %v627_v5 = vpack.c.bf16 %v1169_v3, %v549_v4 }
 0x114   : > { %v1172_v6 = vpop.f32.mrb[20].mxu0  ;;  %1070 = vmatprep.subr.bf16.mxu0 %v627_v5  ;;  %1197 = vmatprep.subr.bf16.mxu1 %v627_v5 }
 0x115   : > { %v559_v7 = vpop.f32.mrb[21].mxu0  ;;  %1071 = vmatpush3.bf16.msra.mxu0 %v619_v45  ;;  %1205 = vmatpush3.bf16.msra.mxu1 %v619_v45 }
 0x116   : > { %v628_v8 = vpack.c.bf16 %v1172_v6, %v559_v7 }
 0x118   : > { %v1175_v9 = vpop.f32.mrb[22].mxu0  ;;  %1072 = vmatprep.subr.bf16.mxu0 %v628_v8  ;;  %1198 = vmatprep.subr.bf16.mxu1 %v628_v8 }
 0x119   : > { %v569_v10 = vpop.f32.mrb[23].mxu0  ;;  %1073 = vmatpush3.bf16.msra.mxu0 %v620_v48  ;;  %1206 = vmatpush3.bf16.msra.mxu1 %v620_v48 }
 0x11a   : > { %v629_v11 = vpack.c.bf16 %v1175_v9, %v569_v10 }
 0x11c   : > { %v1178_v12 = vpop.f32.mrb[24].mxu0  ;;  %1074 = vmatprep.subr.bf16.mxu0 %v629_v11  ;;  %1199 = vmatprep.subr.bf16.mxu1 %v629_v11 }
 0x11d   : > { %v579_v13 = vpop.f32.mrb[25].mxu0  ;;  %1075 = vmatpush3.bf16.msra.mxu0 %v621_v51  ;;  %1207 = vmatpush3.bf16.msra.mxu1 %v621_v51 }
 0x11e   : > { %v630_v14 = vpack.c.bf16 %v1178_v12, %v579_v13 }
 0x120   : > { %v1181_v15 = vpop.f32.mrb[26].mxu0  ;;  %1076 = vmatprep.subr.bf16.mxu0 %v630_v14  ;;  %1200 = vmatprep.subr.bf16.mxu1 %v630_v14 }
 0x121   : > { %v589_v16 = vpop.f32.mrb[27].mxu0  ;;  %1077 = vmatpush3.bf16.msra.mxu0 %v622_v54  ;;  %1208 = vmatpush3.bf16.msra.mxu1 %v622_v54 }
 0x122   : > { %v631_v17 = vpack.c.bf16 %v1181_v15, %v589_v16 }
 0x124   : > { %v1184_v18 = vpop.f32.mrb[28].mxu0  ;;  %1078 = vmatprep.subr.bf16.mxu0 %v631_v17  ;;  %1201 = vmatprep.subr.bf16.mxu1 %v631_v17 }
 0x125   : > { %v599_v19 = vpop.f32.mrb[29].mxu0  ;;  %1079 = vmatpush3.bf16.msra.mxu0 %v623_v57  ;;  %1209 = vmatpush3.bf16.msra.mxu1 %v623_v57 }
 0x126   : > { %v632_v20 = vpack.c.bf16 %v1184_v18, %v599_v19 }
 0x128   : > { %v1187_v21 = vpop.f32.mrb[30].mxu0  ;;  %1080 = vmatprep.subr.bf16.mxu0 %v632_v20  ;;  %1202 = vmatprep.subr.bf16.mxu1 %v632_v20 }
 0x129   : > { %v609_v22 = vpop.f32.mrb[31].mxu0  ;;  %1081 = vmatpush3.bf16.msra.mxu0 %v624_v60  ;;  %1210 = vmatpush3.bf16.msra.mxu1 %v624_v60 }
 0x12a   : > { %v633_v23 = vpack.c.bf16 %v1187_v21, %v609_v22 }
 0x12c   : > { %1082 = vmatprep.subr.bf16.mxu0 %v633_v23  ;;  %1203 = vmatprep.subr.bf16.mxu1 %v633_v23 }
 0x12d   : > { %1083 = vmatpush3.bf16.msra.mxu0 %v625_v63  ;;  %1211 = vmatpush3.bf16.msra.mxu1 %v625_v63 }
 0x130   : > { %787 = vmatmul.mubr.bf16.vlgmr.msra.gmra.mrb[0].mxu1 %v1269_v24  ;;  %779 = vmatmul.mubr.bf16.vlgmr.msra.gmra.mrb[32].mxu0 %v1287_v25 }
 0x131   : > { %794 = vmatprep.mubr.bf16.mxu1 %v1272_v26 }
 0x138   : > { %795 = vmatmul.mubr.bf16.gmra.mrb[4].mxu1 %v1274_v27 }
 0x139   : > { %802 = vmatprep.mubr.bf16.mxu1 %v1275_v28 }
 0x140   : > { %803 = vmatmul.mubr.bf16.gmra.mrb[8].mxu1 %v1277_v29 }
 0x141   : > { %810 = vmatprep.mubr.bf16.mxu1 %v1278_v30 }
 0x148   : > { %811 = vmatmul.mubr.bf16.gmra.mrb[12].mxu1 %v1280_v31 }
 0x149   : > { %818 = vmatprep.mubr.bf16.mxu1 %v1281_v32 }
 0x150   : > { %819 = vmatmul.mubr.bf16.gmra.mrb[16].mxu1 %v1283_v33 }
 0x151   : > { %826 = vmatprep.mubr.bf16.mxu1 %v1284_v34 }
 0x158   : > { %827 = vmatmul.mubr.bf16.gmra.mrb[20].mxu1 %v1286_v35 }
 0x159   : > { %834 = vmatprep.mubr.bf16.mxu1 %v1290_v36 }
 0x160   : > { %835 = vmatmul.mubr.bf16.gmra.mrb[24].mxu1 %v1292_v37 }
 0x203   : > { %v1090_v38 = vpop.f32.mrb[0].mxu1  ;;  %v1084_v39 = vpop.f32.mrb[32].mxu0 }
 0x204   : > { %v1091_v41 = vpop.f32.mrb[1].mxu1  ;;  %v1085_v42 = vpop.f32.mrb[33].mxu0 }
 0x205   : > { %v1092_v43 = vadd.f32 %v1091_v41, %v1090_v38  ;;  %v1093_v44 = vpop.f32.mrb[2].mxu1  ;;  %v1086_v45 = vadd.f32 %v1085_v42, %v1084_v39  ;;  %v1087_v46 = vpop.f32.mrb[34].mxu0 }
 0x206   : > { %v1094_v47 = vpop.f32.mrb[3].mxu1  ;;  %v1088_v48 = vpop.f32.mrb[35].mxu0 }
 0x207   : > { %v845_v49 = vadd.f32 %v1092_v43, %v1624_v40  ;;  %v1095_v50 = vadd.f32 %v1094_v47, %v1093_v44  ;;  %v843_v51 = vadd.f32 %v1086_v45, %v1624_v40  ;;  %v1089_v52 = vadd.f32 %v1088_v48, %v1087_v46 }
 0x209   : > { %861 = vst [vmem:[%s1628_s30 + $0x10] sm:$0xff] %v845_v49  ;;  %v846_v53 = vadd.f32 %v1095_v50, %v1624_v40  ;;  %859 = vst [vmem:[%s1628_s30] sm:$0xff] %v843_v51  ;;  %v844_v54 = vadd.f32 %v1089_v52, %v1624_v40 }
 0x20b   : > { %862 = vst [vmem:[%s1628_s30 + $0x18] sm:$0xff] %v846_v53  ;;  %v1096_v55 = vpop.f32.mrb[4].mxu1  ;;  %860 = vst [vmem:[%s1628_s30 + $0x8] sm:$0xff] %v844_v54 }
 0x20c   : > { %v1097_v56 = vpop.f32.mrb[5].mxu1 }
 0x20d   : > { %v1098_v57 = vadd.f32 %v1097_v56, %v1096_v55  ;;  %v1099_v58 = vpop.f32.mrb[6].mxu1 }
 0x20e   : > { %v1100_v59 = vpop.f32.mrb[7].mxu1 }
 0x20f   : > { %v847_v60 = vadd.f32 %v1098_v57, %v1624_v40  ;;  %v1101_v61 = vadd.f32 %v1100_v59, %v1099_v58 }
 0x211   : > { %863 = vst [vmem:[%s1628_s30 + $0x20] sm:$0xff] %v847_v60  ;;  %v848_v62 = vadd.f32 %v1101_v61, %v1624_v40 }
 0x213   : > { %864 = vst [vmem:[%s1628_s30 + $0x28] sm:$0xff] %v848_v62  ;;  %v1102_v63 = vpop.f32.mrb[8].mxu1 }
 0x214   : > { %v1103_v0 = vpop.f32.mrb[9].mxu1 }
 0x215   : > { %v1104_v1 = vadd.f32 %v1103_v0, %v1102_v63  ;;  %v1105_v2 = vpop.f32.mrb[10].mxu1 }
 0x216   : > { %v1106_v3 = vpop.f32.mrb[11].mxu1 }
 0x217   : > { %v849_v4 = vadd.f32 %v1104_v1, %v1624_v40  ;;  %v1107_v5 = vadd.f32 %v1106_v3, %v1105_v2 }
 0x219   : > { %865 = vst [vmem:[%s1628_s30 + $0x30] sm:$0xff] %v849_v4  ;;  %v850_v6 = vadd.f32 %v1107_v5, %v1624_v40 }
 0x21b   : > { %866 = vst [vmem:[%s1628_s30 + $0x38] sm:$0xff] %v850_v6  ;;  %v1108_v7 = vpop.f32.mrb[12].mxu1 }
 0x21c   : > { %v1109_v8 = vpop.f32.mrb[13].mxu1 }
 0x21d   : > { %v1110_v9 = vadd.f32 %v1109_v8, %v1108_v7  ;;  %v1111_v10 = vpop.f32.mrb[14].mxu1 }
 0x21e   : > { %v1112_v11 = vpop.f32.mrb[15].mxu1 }
 0x21f   : > { %v851_v12 = vadd.f32 %v1110_v9, %v1624_v40  ;;  %v1113_v13 = vadd.f32 %v1112_v11, %v1111_v10 }
 0x221   : > { %867 = vst [vmem:[%s1628_s30 + $0x40] sm:$0xff] %v851_v12  ;;  %v852_v14 = vadd.f32 %v1113_v13, %v1624_v40 }
 0x223   : > { %868 = vst [vmem:[%s1628_s30 + $0x48] sm:$0xff] %v852_v14  ;;  %v1114_v15 = vpop.f32.mrb[16].mxu1 }
 0x224   : > { %v1115_v16 = vpop.f32.mrb[17].mxu1 }
 0x225   : > { %v1116_v17 = vadd.f32 %v1115_v16, %v1114_v15  ;;  %v1117_v18 = vpop.f32.mrb[18].mxu1 }
 0x226   : > { %v1118_v19 = vpop.f32.mrb[19].mxu1 }
 0x227   : > { %v853_v20 = vadd.f32 %v1116_v17, %v1624_v40  ;;  %v1119_v21 = vadd.f32 %v1118_v19, %v1117_v18 }
 0x229   : > { %869 = vst [vmem:[%s1628_s30 + $0x50] sm:$0xff] %v853_v20  ;;  %v854_v22 = vadd.f32 %v1119_v21, %v1624_v40 }
 0x22b   : > { %870 = vst [vmem:[%s1628_s30 + $0x58] sm:$0xff] %v854_v22  ;;  %v1120_v23 = vpop.f32.mrb[20].mxu1 }
 0x22c   : > { %v1121_v24 = vpop.f32.mrb[21].mxu1 }
 0x22d   : > { %v1122_v25 = vadd.f32 %v1121_v24, %v1120_v23  ;;  %v1123_v26 = vpop.f32.mrb[22].mxu1 }
 0x22e   : > { %v1124_v27 = vpop.f32.mrb[23].mxu1 }
 0x22f   : > { %v855_v28 = vadd.f32 %v1122_v25, %v1624_v40  ;;  %v1125_v29 = vadd.f32 %v1124_v27, %v1123_v26 }
 0x231   : > { %871 = vst [vmem:[%s1628_s30 + $0x60] sm:$0xff] %v855_v28  ;;  %v856_v30 = vadd.f32 %v1125_v29, %v1624_v40 }
 0x233   : > { %872 = vst [vmem:[%s1628_s30 + $0x68] sm:$0xff] %v856_v30  ;;  %v1126_v31 = vpop.f32.mrb[24].mxu1 }
 0x234   : > { %v1127_v32 = vpop.f32.mrb[25].mxu1 }
 0x235   : > { %v1128_v33 = vadd.f32 %v1127_v32, %v1126_v31  ;;  %v1129_v34 = vpop.f32.mrb[26].mxu1 }
 0x236   : > { %v1130_v35 = vpop.f32.mrb[27].mxu1 }
 0x237   : > { %v857_v36 = vadd.f32 %v1128_v33, %v1624_v40  ;;  %v1131_v37 = vadd.f32 %v1130_v35, %v1129_v34 }
 0x239   : > { %873 = vst [vmem:[%s1628_s30 + $0x70] sm:$0xff] %v857_v36  ;;  %v858_v38 = vadd.f32 %v1131_v37, %v1624_v40 }
 0x23b   : > { %874 = vst [vmem:[%s1628_s30 + $0x78] sm:$0xff] %v858_v38 }
 0x23c   : > { %1306 = shalt.err (!%p1303_p5)
}
 0x23d   : > { %s1307_s14 = scalar_lea.hbm %s1662_s9, 2048  ;;  %s1311_s24 = scalar_lea.hbm %s1721_s4, 4096 }
 0x23e   : > { %p1308_p6 = scmp.ne.s32.totalorder %s1662_s9, %s1307_s14  ;;  %p1312_p10 = scmp.lt.u32.totalorder %s1662_s9, %s1721_s4 }
 0x23f   : > { %p1313_p11 = scmp.lt.u32.totalorder %s1311_s24, %s1307_s14  ;;  %p1315_p13 = scmp.lt.u32.totalorder %s1307_s14, %s1662_s9 }
 0x240   : > { %p1309_p7 = pnand %p1308_p6, %p1441_p4 }
 0x241   : > { %p1314_p12 = por %p1313_p11, %p1312_p10 }
 0x242   : > { %p1310_p9 = pneg %p1309_p7 }
 0x243   : > { %p1316_p0 = por %p1315_p13, %p1314_p12 }
 0x245   : > { %p1317_p1 = pnand %p1316_p0, %p1310_p9 }
 0x247   : > { %1320 = shalt.err (!%p1317_p1)
}
 0x248   : > { %s1374_s30 = smov 128   ;;  %s1375_s5 = smov 8  }
 0x249   : > { %1212 = dma.vmem_to_hbm [thread:$0]  (%p1441_p4), %s1664_s6, 2048, %s1662_s9, %s1671_s18, %s1374_s30, %s1374_s30, %s1375_s5  }
 0x24a PF: > { %p1218_p2 = scmp.ge.s32.totalorder %s1371_s20, 2  ;;  %s904_s7 = sand.u32 1, %s1351_s15  }
 0x24b   : > { %s905_s8 = scalar_lea.sflag [#allocation3], %s904_s7 }
 0x24c   : > { %p1215_p3 = pnand %p1218_p2, %p1448_p8 }
 0x24e   : > { %1346 = dma.done.wait (!%p1215_p3), %s905_s8, 2048  }
 0x24f   : > { %1348 = vsyncadd (!%p1215_p3), %s905_s8, 4294965248  ;;  %s17_s20 = sadd.s32 1, %s1371_s20   ;;  %s1724_s15 = smov %s1355_s16 }
 0x250   : > { %p14_p5 = scmp.ge.s32.totalorder %s17_s20, 4   ;;  %s1725_s16 = smov %s1359_s17 }
 0x251   : > { %s1726_s17 = smov %s1454_s28  ;;  %s1727_s18 = smov %s1367_s19 }
 0x252   : > { %s1728_s19 = smov %s1730_s23  ;;  %16 = sbr.rel (!%p14_p5) target bundleno = 4 (0x4), region = 76 }
 0x259   :  { %910 = vsyncpa [#allocation3], 1 }
 0x25a   :  { %912 = vsyncpa [#allocation3 + $0x1], 1 }

</bundles_post_ra>
